<compile_context>
chip_gen: v7x
topology: tpu7x:2x2x1
jax: 0.10.0
libtpu: 0.0.40
codegen_flags: <defaults>
</compile_context>

<pallas_src>
import jax
import jax.numpy as jnp
from jax.experimental import pallas as pl
from jax.experimental.pallas import tpu as pltpu


D_IN = 28 * 28          # 784
HID = 50                # true hidden width
N_OUT = 10              # true logits width
H_PAD = 128             # lane-dense padded hidden width
MIN_STEPS = 8           # keep >= several grid steps per TensorCore (v7x: 2 TCs)


def _round_up(x, m):
    return ((x + m - 1) // m) * m


def _pad_to(a, shape):
    return jnp.pad(a, [(0, t - s) for s, t in zip(a.shape, shape)])


def _tpu_config():
    """Generation-aware tile / VMEM / dtype defaults (conservative fallback)."""
    kind = ""
    try:
        kind = jax.devices()[0].device_kind.lower()
    except Exception:
        pass
    if ("v5" in kind) or ("v6" in kind):
        # 128 MiB-VMEM parts: big batch tiles, generous scoped-VMEM limit.
        cfg = {"tb_max": 8192, "vmem_limit": 100 << 20}
    else:
        # v7x (64 MiB VMEM per TC) or unknown backend: stay conservative.
        cfg = {"tb_max": 4096, "vmem_limit": 48 << 20}
    # v5e has no full-rate f32 MXU path -> run the dominant layer-1 dot in bf16.
    cfg["l1_dtype"] = jnp.bfloat16 if "v5" in kind else jnp.float32
    return cfg


def mlp_kernel(x_ref, w1_ref, b1_ref, w2_ref, b2_ref, w3_ref, b3_ref, o_ref):
    """One (TB, 784) batch tile -> (TB, 10) logits tile."""
    # In-kernel cast for the layer-1 MXU dot (no-op when w1 is f32).  The VPU
    # cast is hidden under the x DMA; HBM still streams x in its native f32.
    x = x_ref[...].astype(w1_ref.dtype)                       # (TB, 784)

    # Layer 1: dominant dot, f32 accumulation, bias + ReLU in f32.
    h = jnp.dot(x, w1_ref[...], preferred_element_type=jnp.float32)
    h = jnp.maximum(h + b1_ref[...], 0.0)                     # (TB, 128)

    # Layer 2 (f32 throughout; weights are VMEM-resident, FLOPs negligible).
    h = jnp.dot(h, w2_ref[...], preferred_element_type=jnp.float32)
    h = jnp.maximum(h + b2_ref[...], 0.0)                     # (TB, 128)

    # Layer 3 (no activation) -> narrow (TB, 10) logits tile.
    out = jnp.dot(h, w3_ref[...], preferred_element_type=jnp.float32)
    out = out + b3_ref[...]                                   # (TB, 10)

    o_ref[...] = out.astype(o_ref.dtype)


def nonlinear_classifier_forward(x_nchw, params, *, l1_dtype=None, tb_max=None,
                                 vmem_limit=None):
    """x_nchw: (B, 1, 28, 28) float32 -> logits (B, 10) float32."""
    cfg = _tpu_config()
    l1_dtype = cfg["l1_dtype"] if l1_dtype is None else l1_dtype
    tb_max = cfg["tb_max"] if tb_max is None else tb_max
    vmem_limit = cfg["vmem_limit"] if vmem_limit is None else vmem_limit

    w1, b1, w2, b2, w3, b3 = params
    B = x_nchw.shape[0]

    # nn.Flatten(): (B, 784).  No cast here; x streams in its native f32.
    x_flat = x_nchw.reshape(B, D_IN)

    # Zero-pad the tiny weights to MXU-friendly tiles (math stays exact:
    # padded hidden columns are relu(0+0)=0 and padded rows multiply zeros).
    # All of these are VMEM-resident (read from HBM once).
    w1p = _pad_to(w1, (D_IN, H_PAD)).astype(l1_dtype)
    b1p = _pad_to(b1, (1, H_PAD)).astype(jnp.float32)
    w2p = _pad_to(w2, (H_PAD, H_PAD)).astype(jnp.float32)
    b2p = _pad_to(b2, (1, H_PAD)).astype(jnp.float32)
    w3p = _pad_to(w3, (H_PAD, N_OUT)).astype(jnp.float32)
    b3p = b3.astype(jnp.float32)

    # Batch tile: multiple of 8, capped by tb_max, and small enough that the
    # grid has >= MIN_STEPS steps (keeps the pipeline busy on both v7x TCs).
    TB = max(8, min(tb_max, _round_up(pl.cdiv(B, MIN_STEPS), 8)))
    grid_b = pl.cdiv(B, TB)   # ragged tail: Pallas pad-reads / mask-writes it

    resident = lambda shape: pl.BlockSpec(shape, lambda i: (0, 0))

    return pl.pallas_call(
        mlp_kernel,
        out_shape=jax.ShapeDtypeStruct((B, N_OUT), jnp.float32),
        grid=(grid_b,),
        in_specs=[
            pl.BlockSpec((TB, D_IN), lambda i: (i, 0)),   # streamed batch tile
            resident((D_IN, H_PAD)), resident((1, H_PAD)),
            resident((H_PAD, H_PAD)), resident((1, H_PAD)),
            resident((H_PAD, N_OUT)), resident((1, N_OUT)),
        ],
        out_specs=pl.BlockSpec((TB, N_OUT), lambda i: (i, 0)),
        compiler_params=pltpu.CompilerParams(
            dimension_semantics=("parallel",),            # shard batch over TCs
            vmem_limit_bytes=vmem_limit,
        ),
    )(x_flat, w1p, b1p, w2p, b2p, w3p, b3p)


def init_params(key):
    """Deterministic init matching PyTorch Linear shapes (stored transposed)."""
    k1, k2, k3, k4, k5, k6 = jax.random.split(key, 6)

    def linear(kw, kb, fan_in, fan_out):
        bound = 1.0 / jnp.sqrt(fan_in)
        w = jax.random.uniform(kw, (fan_in, fan_out), jnp.float32, -bound, bound)
        b = jax.random.uniform(kb, (1, fan_out), jnp.float32, -bound, bound)
        return w, b

    w1, b1 = linear(k1, k2, D_IN, HID)
    w2, b2 = linear(k3, k4, HID, HID)
    w3, b3 = linear(k5, k6, HID, N_OUT)
    return (w1, b1, w2, b2, w3, b3)


def ref_forward(x_nchw, params, l1_dtype=jnp.float32):
    """Pure-JAX reference: layer-1 dot in l1_dtype, everything else f32."""
    w1, b1, w2, b2, w3, b3 = params
    xf = x_nchw.reshape(x_nchw.shape[0], -1)
    h = jnp.dot(xf.astype(l1_dtype), w1.astype(l1_dtype),
                preferred_element_type=jnp.float32) + b1
    h = jnp.maximum(h, 0.0)
    h = jnp.maximum(jnp.dot(h, w2, preferred_element_type=jnp.float32) + b2, 0.0)
    return jnp.dot(h, w3, preferred_element_type=jnp.float32) + b3


if __name__ == "__main__":
    key = jax.random.PRNGKey(0)
    kp, kx, kx2 = jax.random.split(key, 3)

    params = init_params(kp)

    # Small MNIST-like batch (NCHW like PyTorch).
    x = jax.random.normal(kx, (2, 1, 28, 28), dtype=jnp.float32)

    # Explicit f32 layer-1 path: tight check.
    logits = nonlinear_classifier_forward(x, params, l1_dtype=jnp.float32)
    jax.block_until_ready(logits)
    assert logits.shape == (2, 10)
    assert jnp.allclose(logits, ref_forward(x, params, jnp.float32),
                        atol=1e-4, rtol=1e-4)

    # Explicit bf16 layer-1 path (v5e default): check vs matching bf16 ref.
    logits_bf = nonlinear_classifier_forward(x, params, l1_dtype=jnp.bfloat16)
    jax.block_until_ready(logits_bf)
    assert jnp.allclose(logits_bf, ref_forward(x, params, jnp.bfloat16),
                        atol=2e-2, rtol=2e-2)

    # Auto (generation-aware) defaults.
    cfg = _tpu_config()
    logits_auto = nonlinear_classifier_forward(x, params)
    jax.block_until_ready(logits_auto)
    assert jnp.allclose(logits_auto, ref_forward(x, params, cfg["l1_dtype"]),
                        atol=2e-2, rtol=2e-2)

    # Multi-step grid + ragged tail: B=20, TB forced to 8 -> grid=3, last block
    # pad-read / mask-written (no wrapper-side jnp.pad of x).
    x_big = jax.random.normal(kx2, (20, 1, 28, 28), dtype=jnp.float32)
    logits_big = nonlinear_classifier_forward(x_big, params,
                                              l1_dtype=jnp.float32, tb_max=8)
    jax.block_until_ready(logits_big)
    assert logits_big.shape == (20, 10)
    assert jnp.allclose(logits_big, ref_forward(x_big, params, jnp.float32),
                        atol=1e-4, rtol=1e-4)

    print("KERNEL_OK")
</pallas_src>

<mosaic_0001>
module attributes {stable_mosaic.version = 11 : i64} {
  func.func @mlp_kernel(%arg0: i32, %arg1: memref<8x784xf32, #tpu.memory_space<vmem>>, %arg2: memref<784x128xf32, #tpu.memory_space<vmem>>, %arg3: memref<1x128xf32, #tpu.memory_space<vmem>>, %arg4: memref<128x128xf32, #tpu.memory_space<vmem>>, %arg5: memref<1x128xf32, #tpu.memory_space<vmem>>, %arg6: memref<128x10xf32, #tpu.memory_space<vmem>>, %arg7: memref<1x10xf32, #tpu.memory_space<vmem>>, %arg8: memref<8x10xf32, #tpu.memory_space<vmem>>) attributes {dimension_semantics = [#tpu.dimension_semantics<parallel>], iteration_bounds = array<i64: 1>, scalar_prefetch = 0 : i64, scratch_operands = 0 : i64, tpu.core_type = #tpu.core_type<tc>, window_params = [{transform_indices = @transform_0, window_bounds = array<i64: 8, 784>}, {pipeline_mode = #tpu.pipeline_mode<synchronous>, transform_indices = @transform_1, window_bounds = array<i64: 784, 128>}, {pipeline_mode = #tpu.pipeline_mode<synchronous>, transform_indices = @transform_2, window_bounds = array<i64: 1, 128>}, {pipeline_mode = #tpu.pipeline_mode<synchronous>, transform_indices = @transform_3, window_bounds = array<i64: 128, 128>}, {pipeline_mode = #tpu.pipeline_mode<synchronous>, transform_indices = @transform_4, window_bounds = array<i64: 1, 128>}, {pipeline_mode = #tpu.pipeline_mode<synchronous>, transform_indices = @transform_5, window_bounds = array<i64: 128, 10>}, {pipeline_mode = #tpu.pipeline_mode<synchronous>, transform_indices = @transform_6, window_bounds = array<i64: 1, 10>}, {transform_indices = @transform_7, window_bounds = array<i64: 8, 10>}]} {
    %c0 = arith.constant 0 : index
    %c0_0 = arith.constant 0 : index
    %0 = vector.load %arg1[%c0, %c0_0] : memref<8x784xf32, #tpu.memory_space<vmem>>, vector<8x784xf32>
    %c0_1 = arith.constant 0 : index
    %c0_2 = arith.constant 0 : index
    %1 = vector.load %arg2[%c0_1, %c0_2] : memref<784x128xf32, #tpu.memory_space<vmem>>, vector<784x128xf32>
    %cst = arith.constant dense<0.000000e+00> : vector<8x128xf32>
    %2 = tpu.matmul %0, %1, %cst {dimension_numbers = #tpu.dot_dimension_numbers<[1], [0], [0], [1], [0, 0, 1, 1], [], []>} : vector<8x784xf32>, vector<784x128xf32>, vector<8x128xf32> -> vector<8x128xf32>
    %c0_3 = arith.constant 0 : index
    %c0_4 = arith.constant 0 : index
    %3 = vector.load %arg3[%c0_3, %c0_4] : memref<1x128xf32, #tpu.memory_space<vmem>>, vector<1x128xf32>
    %4 = vector.broadcast %3 : vector<1x128xf32> to vector<8x128xf32>
    %5 = arith.addf %2, %4 : vector<8x128xf32>
    %cst_5 = arith.constant 0.000000e+00 : f32
    %6 = vector.broadcast %cst_5 : f32 to vector<8x128xf32>
    %7 = arith.maximumf %5, %6 : vector<8x128xf32>
    %c0_6 = arith.constant 0 : index
    %c0_7 = arith.constant 0 : index
    %8 = vector.load %arg4[%c0_6, %c0_7] : memref<128x128xf32, #tpu.memory_space<vmem>>, vector<128x128xf32>
    %cst_8 = arith.constant dense<0.000000e+00> : vector<8x128xf32>
    %9 = tpu.matmul %7, %8, %cst_8 {dimension_numbers = #tpu.dot_dimension_numbers<[1], [0], [0], [1], [0, 0, 1, 1], [], []>} : vector<8x128xf32>, vector<128x128xf32>, vector<8x128xf32> -> vector<8x128xf32>
    %c0_9 = arith.constant 0 : index
    %c0_10 = arith.constant 0 : index
    %10 = vector.load %arg5[%c0_9, %c0_10] : memref<1x128xf32, #tpu.memory_space<vmem>>, vector<1x128xf32>
    %11 = vector.broadcast %10 : vector<1x128xf32> to vector<8x128xf32>
    %12 = arith.addf %9, %11 : vector<8x128xf32>
    %cst_11 = arith.constant 0.000000e+00 : f32
    %13 = vector.broadcast %cst_11 : f32 to vector<8x128xf32>
    %14 = arith.maximumf %12, %13 : vector<8x128xf32>
    %c0_12 = arith.constant 0 : index
    %c0_13 = arith.constant 0 : index
    %15 = vector.load %arg6[%c0_12, %c0_13] : memref<128x10xf32, #tpu.memory_space<vmem>>, vector<128x10xf32>
    %cst_14 = arith.constant dense<0.000000e+00> : vector<8x10xf32>
    %16 = tpu.matmul %14, %15, %cst_14 {dimension_numbers = #tpu.dot_dimension_numbers<[1], [0], [0], [1], [0, 0, 1, 1], [], []>} : vector<8x128xf32>, vector<128x10xf32>, vector<8x10xf32> -> vector<8x10xf32>
    %c0_15 = arith.constant 0 : index
    %c0_16 = arith.constant 0 : index
    %17 = vector.load %arg7[%c0_15, %c0_16] : memref<1x10xf32, #tpu.memory_space<vmem>>, vector<1x10xf32>
    %18 = vector.broadcast %17 : vector<1x10xf32> to vector<8x10xf32>
    %19 = arith.addf %16, %18 : vector<8x10xf32>
    %c0_17 = arith.constant 0 : index
    %c0_18 = arith.constant 0 : index
    %20 = vector.load %arg8[%c0_17, %c0_18] : memref<8x10xf32, #tpu.memory_space<vmem>>, vector<8x10xf32>
    tpu.vector_store %arg8[%c0_17, %c0_18], %19 {strides = array<i32>} : memref<8x10xf32, #tpu.memory_space<vmem>>, vector<8x10xf32>,
    return
  }
  func.func @transform_0(%arg0: i32) -> (i32, i32) {
    %c0_i32 = arith.constant 0 : i32
    %c0_i32_0 = arith.constant 0 : i32
    return %arg0, %c0_i32 : i32, i32
  }
  func.func @transform_1(%arg0: i32) -> (i32, i32) {
    %c0_i32 = arith.constant 0 : i32
    %c0_i32_0 = arith.constant 0 : i32
    %c0_i32_1 = arith.constant 0 : i32
    return %c0_i32, %c0_i32_0 : i32, i32
  }
  func.func @transform_2(%arg0: i32) -> (i32, i32) {
    %c0_i32 = arith.constant 0 : i32
    %c0_i32_0 = arith.constant 0 : i32
    %c0_i32_1 = arith.constant 0 : i32
    return %c0_i32, %c0_i32_0 : i32, i32
  }
  func.func @transform_3(%arg0: i32) -> (i32, i32) {
    %c0_i32 = arith.constant 0 : i32
    %c0_i32_0 = arith.constant 0 : i32
    %c0_i32_1 = arith.constant 0 : i32
    return %c0_i32, %c0_i32_0 : i32, i32
  }
  func.func @transform_4(%arg0: i32) -> (i32, i32) {
    %c0_i32 = arith.constant 0 : i32
    %c0_i32_0 = arith.constant 0 : i32
    %c0_i32_1 = arith.constant 0 : i32
    return %c0_i32, %c0_i32_0 : i32, i32
  }
  func.func @transform_5(%arg0: i32) -> (i32, i32) {
    %c0_i32 = arith.constant 0 : i32
    %c0_i32_0 = arith.constant 0 : i32
    %c0_i32_1 = arith.constant 0 : i32
    return %c0_i32, %c0_i32_0 : i32, i32
  }
  func.func @transform_6(%arg0: i32) -> (i32, i32) {
    %c0_i32 = arith.constant 0 : i32
    %c0_i32_0 = arith.constant 0 : i32
    %c0_i32_1 = arith.constant 0 : i32
    return %c0_i32, %c0_i32_0 : i32, i32
  }
  func.func @transform_7(%arg0: i32) -> (i32, i32) {
    %c0_i32 = arith.constant 0 : i32
    %c0_i32_0 = arith.constant 0 : i32
    return %arg0, %c0_i32 : i32, i32
  }
}

</mosaic_0001>

<bundles_post_ra>
// kernel: tpu_custom_call.1
= control target key start
LH: loop header
LB: loop body
LE: loop exit
PB: predicated region body
PF: predicated region fallthrough
CT: control target
= control target key end

     0   :  { %12 = vsyncpa [#allocation3], 0  ;;  %s1402_s0 = inlined_call_operand.vmem [shape: f32[2,784], index: 0, kind: input, shape index: {}]   ;;  %s1403_s1 = inlined_call_operand.hbm [shape: f32[784,128], index: 1, kind: input, shape index: {}]   ;;  %s1404_s2 = inlined_call_operand.vmem [shape: f32[1,128], index: 2, kind: input, shape index: {}]   ;;  %s1405_s3 = inlined_call_operand.vmem [shape: f32[128,128], index: 3, kind: input, shape index: {}]   ;;  %s1406_s4 = inlined_call_operand.vmem [shape: f32[1,128], index: 4, kind: input, shape index: {}]   ;;  %s1407_s5 = inlined_call_operand.vmem [shape: f32[128,10], index: 5, kind: input, shape index: {}]   ;;  %s1408_s6 = inlined_call_operand.vmem [shape: f32[1,10], index: 6, kind: input, shape index: {}]   ;;  %s1409_s7 = inlined_call_operand.hbm [shape: f32[2,10], index: 7, kind: output, shape index: {}]  }
   0x1   :  { %13 = vsyncpa [#allocation4], 0  ;;  %s1169_s24 = smov [#allocation2]   ;;  %s1121_s28 = scalar_lea.hbm %s1403_s1, 12544 }
   0x2   :  { %s21_s25 = sshll.u32 %s1169_s24, 4  ;;  %p1122_p0 = scmp.ne.s32.totalorder %s1403_s1, %s1121_s28  ;;  %s22_s25 = int_to_ptr.vmem [resolvable:$true] %s21_s25 }
   0x3   :  { %p1125_p1 = scmp.lt.u32.totalorder %s1121_s28, %s1403_s1 }
   0x5   :  { %p1127_p2 = pnand %p1125_p1, %p1122_p0 }
   0x7   :  { %1130 = shalt.err (!%p1127_p2)
}
   0x8   :  { %s1131_s10 = scalar_lea.vmem %s22_s25, 12544  ;;  %p1136_p4 = scmp.lt.s32.totalorder %s22_s25, %s22_s25 }
   0x9   :  { %p1132_p3 = scmp.ne.s32.totalorder %s22_s25, %s1131_s10  ;;  %p1137_p5 = scmp.lt.s32.totalorder %s1131_s10, %s1131_s10 }
   0xb   :  { %p1138_p6 = por %p1137_p5, %p1136_p4 }
   0xd   :  { %p1139_p7 = pnand %p1138_p6, %p1132_p3 }
   0xf   :  { %1142 = shalt.err (!%p1139_p7)
}
  0x10   :  { %s1170_s11 = smov 128   ;;  %s1171_s12 = smov 8  }
  0x11   :  { %27 = dma.hbm_to_vmem [thread:$0]  %s1403_s1, 12544, %s22_s25, [#allocation3], %s1170_s11, %s1170_s11, %s1171_s12  }
  0x12   :  { %1165 = dma.done.wait [#allocation3], 12544  }
  0x13   :  { %1166 = vsyncadd [#allocation3], 4294954752  ;;  %v65_v0 = vld [vmem:[#allocation2 + $0x80] sm:$0xff]  ;;  %v66_v1 = vld [vmem:[#allocation2 + $0x88] sm:$0xff]  ;;  %v1172_v51 = vmov 1983009808   ;;  %v169_v53 = vlaneseq }
  0x14   :  { %v49_v2 = vld [vmem:[#allocation2] sm:$0xff]  ;;  %v952_v3 = vpack.c.bf16 %v66_v1, %v65_v0  ;;  %v50_v4 = vld [vmem:[#allocation2 + $0x8] sm:$0xff]  ;;  %v67_v11 = vld [vmem:[#allocation2 + $0x90] sm:$0xff]  ;;  %v167_v52 = vunpack.c.l.s4 %v1172_v51  ;;  %vm1174_vm0 = vmmov 0   ;;  %vm239_vm1 = vcmask 130048  }
  0x15   :  { %v97_v5 = vld [vmem:[#allocation2 + $0x180] sm:$0xff]  ;;  %v98_v6 = vld [vmem:[#allocation2 + $0x188] sm:$0xff]  ;;  %v954_v7 = vpack.c.bf16 %v50_v4, %v49_v2  ;;  %v68_v13 = vld [vmem:[#allocation2 + $0x98] sm:$0xff]  ;;  %vm710_vm2 = vcmask 80896  }
  0x16   :  { %v984_v8 = vpack.c.bf16 %v98_v6, %v97_v5  ;;  %v81_v9 = vld [vmem:[#allocation2 + $0x100] sm:$0xff]  ;;  %v82_v10 = vld [vmem:[#allocation2 + $0x108] sm:$0xff]  ;;  %953 = vmatprep.subr.bf16.mxu0 %v952_v3  ;;  %v51_v14 = vld [vmem:[#allocation2 + $0x10] sm:$0xff]  ;;  %v956_v16 = vpack.c.bf16 %v68_v13, %v67_v11  ;;  %v168_v2 = vunpack.c.0.s8 %v167_v52  ;;  %v170_v3 = vshrl.u32 %v169_v53, 7 }
  0x17   :  { %v986_v12 = vpack.c.bf16 %v82_v10, %v81_v9  ;;  %v52_v15 = vld [vmem:[#allocation2 + $0x18] sm:$0xff]  ;;  %955 = vmatpush3.bf16.msra.mxu0 %v954_v7  ;;  %v99_v18 = vld [vmem:[#allocation2 + $0x190] sm:$0xff]  ;;  %v69_v23 = vld [vmem:[#allocation2 + $0xa0] sm:$0xff] }
  0x18   :  { %985 = vmatprep.subr.bf16.mxu1 %v984_v8  ;;  %v958_v17 = vpack.c.bf16 %v52_v15, %v51_v14  ;;  %v100_v19 = vld [vmem:[#allocation2 + $0x198] sm:$0xff]  ;;  %v83_v20 = vld [vmem:[#allocation2 + $0x110] sm:$0xff]  ;;  %v70_v24 = vld [vmem:[#allocation2 + $0xa8] sm:$0xff]  ;;  %957 = vmatprep.subr.bf16.mxu0 %v956_v16 }
  0x19   :  { %987 = vmatpush3.bf16.msra.mxu1 %v986_v12  ;;  %v988_v21 = vpack.c.bf16 %v100_v19, %v99_v18  ;;  %v84_v22 = vld [vmem:[#allocation2 + $0x118] sm:$0xff]  ;;  %v960_v26 = vpack.c.bf16 %v70_v24, %v69_v23  ;;  %v53_v27 = vld [vmem:[#allocation2 + $0x20] sm:$0xff]  ;;  %v54_v28 = vld [vmem:[#allocation2 + $0x28] sm:$0xff] }
  0x1a   :  { %v990_v25 = vpack.c.bf16 %v84_v22, %v83_v20  ;;  %v101_v29 = vld [vmem:[#allocation2 + $0x1a0] sm:$0xff]  ;;  %v102_v30 = vld [vmem:[#allocation2 + $0x1a8] sm:$0xff]  ;;  %v962_v33 = vpack.c.bf16 %v54_v28, %v53_v27  ;;  %v71_v35 = vld [vmem:[#allocation2 + $0xb0] sm:$0xff] }
  0x1b   :  { %989 = vmatprep.subr.bf16.mxu1 %v988_v21  ;;  %v85_v31 = vld [vmem:[#allocation2 + $0x120] sm:$0xff]  ;;  %v86_v32 = vld [vmem:[#allocation2 + $0x128] sm:$0xff]  ;;  %959 = vmatpush3.bf16.msra.mxu0 %v958_v17  ;;  %v992_v34 = vpack.c.bf16 %v102_v30, %v101_v29  ;;  %v72_v36 = vld [vmem:[#allocation2 + $0xb8] sm:$0xff]  ;;  %v1231_v21 = vsub.s32 %v168_v2, %v170_v3 }
  0x1c   :  { %v55_v37 = vld [vmem:[#allocation2 + $0x30] sm:$0xff]  ;;  %961 = vmatprep.subr.bf16.mxu0 %v960_v26  ;;  %v994_v38 = vpack.c.bf16 %v86_v32, %v85_v31  ;;  %v964_v39 = vpack.c.bf16 %v72_v36, %v71_v35  ;;  %v56_v40 = vld [vmem:[#allocation2 + $0x38] sm:$0xff]  ;;  %v73_v46 = vld [vmem:[#allocation2 + $0xc0] sm:$0xff] }
  0x1d   :  { %991 = vmatpush3.bf16.msra.mxu1 %v990_v25  ;;  %v103_v41 = vld [vmem:[#allocation2 + $0x1b0] sm:$0xff]  ;;  %v104_v42 = vld [vmem:[#allocation2 + $0x1b8] sm:$0xff]  ;;  %v74_v47 = vld [vmem:[#allocation2 + $0xc8] sm:$0xff]  ;;  %v966_v48 = vpack.c.bf16 %v56_v40, %v55_v37 }
  0x1e   :  { %993 = vmatprep.subr.bf16.mxu1 %v992_v34  ;;  %v996_v43 = vpack.c.bf16 %v104_v42, %v103_v41  ;;  %v87_v44 = vld [vmem:[#allocation2 + $0x130] sm:$0xff]  ;;  %v88_v45 = vld [vmem:[#allocation2 + $0x138] sm:$0xff]  ;;  %v105_v49 = vld [vmem:[#allocation2 + $0x1c0] sm:$0xff]  ;;  %v968_v55 = vpack.c.bf16 %v74_v47, %v73_v46 }
  0x1f   :  { %963 = vmatpush3.bf16.msra.mxu0 %v962_v33  ;;  %v106_v50 = vld [vmem:[#allocation2 + $0x1c8] sm:$0xff]  ;;  %v998_v54 = vpack.c.bf16 %v88_v45, %v87_v44  ;;  %v57_v56 = vld [vmem:[#allocation2 + $0x40] sm:$0xff]  ;;  %v75_v61 = vld [vmem:[#allocation2 + $0xd0] sm:$0xff] }
  0x20   :  { %965 = vmatprep.subr.bf16.mxu0 %v964_v39  ;;  %v58_v57 = vld [vmem:[#allocation2 + $0x48] sm:$0xff]  ;;  %v89_v58 = vld [vmem:[#allocation2 + $0x140] sm:$0xff]  ;;  %v1000_v59 = vpack.c.bf16 %v106_v50, %v105_v49  ;;  %v76_v62 = vld [vmem:[#allocation2 + $0xd8] sm:$0xff] }
  0x21   :  { %995 = vmatpush3.bf16.msra.mxu1 %v994_v38  ;;  %v90_v60 = vld [vmem:[#allocation2 + $0x148] sm:$0xff]  ;;  %v107_v63 = vld [vmem:[#allocation2 + $0x1d0] sm:$0xff]  ;;  %v108_v0 = vld [vmem:[#allocation2 + $0x1d8] sm:$0xff]  ;;  %v970_v1 = vpack.c.bf16 %v58_v57, %v57_v56  ;;  %v972_v5 = vpack.c.bf16 %v76_v62, %v75_v61 }
  0x22   :  { %997 = vmatprep.subr.bf16.mxu1 %v996_v43  ;;  %v1002_v4 = vpack.c.bf16 %v90_v60, %v89_v58  ;;  %v59_v6 = vld [vmem:[#allocation2 + $0x50] sm:$0xff]  ;;  %v60_v7 = vld [vmem:[#allocation2 + $0x58] sm:$0xff]  ;;  %v1004_v9 = vpack.c.bf16 %v108_v0, %v107_v63  ;;  %v77_v11 = vld [vmem:[#allocation2 + $0xe0] sm:$0xff]  ;;  %v1173_v63 = vmov 0.0|0.0  }
  0x23   :  { %967 = vmatpush3.bf16.msra.mxu0 %v966_v48  ;;  %v91_v8 = vld [vmem:[#allocation2 + $0x150] sm:$0xff]  ;;  %v92_v10 = vld [vmem:[#allocation2 + $0x158] sm:$0xff]  ;;  %v78_v12 = vld [vmem:[#allocation2 + $0xe8] sm:$0xff]  ;;  %v974_v17 = vpack.c.bf16 %v60_v7, %v59_v6 }
  0x24   :  { %969 = vmatprep.subr.bf16.mxu0 %v968_v55  ;;  %v61_v13 = vld [vmem:[#allocation2 + $0x60] sm:$0xff]  ;;  %v62_v14 = vld [vmem:[#allocation2 + $0x68] sm:$0xff]  ;;  %v79_v20 = vld [vmem:[#allocation2 + $0xf0] sm:$0xff]  ;;  %v1006_v22 = vpack.c.bf16 %v92_v10, %v91_v8  ;;  %v976_v23 = vpack.c.bf16 %v78_v12, %v77_v11  ;;  %v1175_v10 = vmov 0.0  }
  0x25   :  { %999 = vmatpush3.bf16.msra.mxu1 %v998_v54  ;;  %v109_v15 = vld [vmem:[#allocation2 + $0x1e0] sm:$0xff]  ;;  %v110_v16 = vld [vmem:[#allocation2 + $0x1e8] sm:$0xff]  ;;  %v80_v25 = vld [vmem:[#allocation2 + $0xf8] sm:$0xff]  ;;  %v978_v30 = vpack.c.bf16 %v62_v14, %v61_v13 }
  0x26   :  { %1001 = vmatprep.subr.bf16.mxu1 %v1000_v59  ;;  %v93_v18 = vld [vmem:[#allocation2 + $0x160] sm:$0xff]  ;;  %v94_v19 = vld [vmem:[#allocation2 + $0x168] sm:$0xff]  ;;  %v1008_v24 = vpack.c.bf16 %v110_v16, %v109_v15  ;;  %v111_v28 = vld [vmem:[#allocation2 + $0x1f0] sm:$0xff]  ;;  %v980_v36 = vpack.c.bf16 %v80_v25, %v79_v20 }
  0x27   :  { %971 = vmatpush3.bf16.msra.mxu0 %v970_v1  ;;  %v1109_v26 = vld [vmem:[%s1402_s0] ss:$14 sps:$4 sm:$0xff]   ;;  %v1111_v27 = vld [vmem:[%s1402_s0 + $0x1c] ss:$14 sps:$4 sm:$0xff]   ;;  %v1113_v33 = vld [vmem:[%s1402_s0 + $0x4] ss:$14 sps:$4 sm:$0xff]   ;;  %v1010_v35 = vpack.c.bf16 %v94_v19, %v93_v18 }
  0x28   :  { %973 = vmatprep.subr.bf16.mxu0 %v972_v5  ;;  %v112_v29 = vld [vmem:[#allocation2 + $0x1f8] sm:$0xff]  ;;  %v172_v31 = vrot.slane %v1109_v26, %v1231_v21  ;;  %v186_v32 = vrot.slane %v1111_v27, %v1231_v21  ;;  %v1114_v34 = vld [vmem:[%s1402_s0 + $0x20] ss:$14 sps:$4 sm:$0xff]   ;;  %v179_v45 = vrot.slane %v1113_v33, %v1231_v21  ;;  %v1118_v7 = vld [vmem:[%s1402_s0 + $0x24] ss:$14 sps:$4 sm:$0xff]  }
  0x29   :  { %1003 = vmatpush3.bf16.msra.mxu1 %v1002_v4  ;;  %v63_v37 = vld [vmem:[#allocation2 + $0x70] sm:$0xff]  ;;  %v64_v38 = vld [vmem:[#allocation2 + $0x78] sm:$0xff]  ;;  %v1012_v40 = vpack.c.bf16 %v112_v29, %v111_v28  ;;  %v129_v43 = vld [vmem:[#allocation2 + $0x280] sm:$0xff]  ;;  %v193_v46 = vrot.slane %v1114_v34, %v1231_v21  ;;  %v222_v16 = vrot.slane %v1118_v7, %v1231_v21 }
  0x2a   :  { %1005 = vmatprep.subr.bf16.mxu1 %v1004_v9  ;;  %v95_v39 = vld [vmem:[#allocation2 + $0x170] sm:$0xff]  ;;  %v195_v41 = vcombine.high %v172_v31, %v186_v32  ;;  %v96_v42 = vld [vmem:[#allocation2 + $0x178] sm:$0xff]  ;;  %v130_v44 = vld [vmem:[#allocation2 + $0x288] sm:$0xff]  ;;  %v982_v47 = vpack.c.bf16 %v64_v38, %v63_v37  ;;  %v194_v55 = vcombine.low %v172_v31, %v186_v32 }
  0x2b   :  { %975 = vmatpush3.bf16.msra.mxu0 %v974_v17  ;;  %v197_v48 = vcombine.high %v179_v45, %v193_v46  ;;  %v1014_v49 = vpack.c.bf16 %v96_v42, %v95_v39  ;;  %v1016_v50 = vpack.c.bf16 %v130_v44, %v129_v43  ;;  %v113_v51 = vld [vmem:[#allocation2 + $0x200] sm:$0xff]  ;;  %v114_v52 = vld [vmem:[#allocation2 + $0x208] sm:$0xff]  ;;  %v131_v53 = vld [vmem:[#allocation2 + $0x290] sm:$0xff]  ;;  %v196_v57 = vcombine.low %v179_v45, %v193_v46 }
  0x2c   :  { %977 = vmatprep.subr.bf16.mxu0 %v976_v23  ;;  %306 = vmatprep.mubr.f32.mxu0 %v195_v41  ;;  %v132_v54 = vld [vmem:[#allocation2 + $0x298] sm:$0xff]  ;;  %v1018_v56 = vpack.c.bf16 %v114_v52, %v113_v51  ;;  %v115_v59 = vld [vmem:[#allocation2 + $0x210] sm:$0xff]  ;;  %v133_v61 = vld [vmem:[#allocation2 + $0x2a0] sm:$0xff] }
  0x2d   :  { %1007 = vmatpush3.bf16.msra.mxu1 %v1006_v22  ;;  %376 = vmatprep.mubr.f32.mxu1 %v197_v48  ;;  %v1020_v58 = vpack.c.bf16 %v132_v54, %v131_v53  ;;  %v116_v60 = vld [vmem:[#allocation2 + $0x218] sm:$0xff]  ;;  %v134_v62 = vld [vmem:[#allocation2 + $0x2a8] sm:$0xff]  ;;  %v117_v0 = vld [vmem:[#allocation2 + $0x220] sm:$0xff] }
  0x2e   :  { %1009 = vmatprep.subr.bf16.mxu1 %v1008_v24  ;;  %v118_v1 = vld [vmem:[#allocation2 + $0x228] sm:$0xff]  ;;  %v1022_v2 = vpack.c.bf16 %v116_v60, %v115_v59  ;;  %v145_v5 = vld [vmem:[#allocation2 + $0x300] sm:$0xff]  ;;  %v1024_v6 = vpack.c.bf16 %v134_v62, %v133_v61  ;;  %v135_v11 = vld [vmem:[#allocation2 + $0x2b0] sm:$0xff] }
  0x2f   :  { %979 = vmatpush3.bf16.msra.mxu0 %v978_v30  ;;  %v1115_v3 = vld [vmem:[%s1402_s0 + $0x8] ss:$14 sps:$4 sm:$0xff]   ;;  %v1117_v4 = vld [vmem:[%s1402_s0 + $0xc] ss:$14 sps:$4 sm:$0x33]   ;;  %v1026_v18 = vpack.c.bf16 %v118_v1, %v117_v0  ;;  %v137_v25 = vld [vmem:[#allocation2 + $0x2c0] sm:$0xff] }
  0x30   :  { %981 = vmatprep.subr.bf16.mxu0 %v980_v36  ;;  %v1120_v8 = vld [vmem:[%s1402_s0 + $0x28] ss:$14 sps:$4 sm:$0x33]   ;;  %v136_v12 = vld [vmem:[#allocation2 + $0x2b8] sm:$0xff]  ;;  %v208_v13 = vrot.slane %v1115_v3, %v1231_v21  ;;  %v215_v14 = vrot.slane %v1117_v4, %v1231_v21  ;;  %v121_v28 = vld [vmem:[#allocation2 + $0x240] sm:$0xff] }
  0x31   :  { %1011 = vmatpush3.bf16.msra.mxu1 %v1010_v35  ;;  %v146_v9 = vld [vmem:[#allocation2 + $0x308] sm:$0xff]  ;;  %v229_v17 = vrot.slane %v1120_v8, %v1231_v21  ;;  %v1028_v19 = vpack.c.bf16 %v136_v12, %v135_v11  ;;  %v119_v20 = vld [vmem:[#allocation2 + $0x230] sm:$0xff]  ;;  %v120_v22 = vld [vmem:[#allocation2 + $0x238] sm:$0xff] }
  0x32   :  { %1013 = vmatprep.subr.bf16.mxu1 %v1012_v40  ;;  %v1049_v15 = vpack.c.bf16 %v146_v9, %v145_v5  ;;  %v231_v23 = vcombine.high %v208_v13, %v222_v16  ;;  %v138_v26 = vld [vmem:[#allocation2 + $0x2c8] sm:$0xff]  ;;  %v1030_v27 = vpack.c.bf16 %v120_v22, %v119_v20  ;;  %v139_v30 = vld [vmem:[#allocation2 + $0x2d0] sm:$0xff]  ;;  %v140_v31 = vld [vmem:[#allocation2 + $0x2d8] sm:$0xff] }
  0x33   :  { %983 = vmatpush3.bf16.msra.mxu0 %v982_v47  ;;  %v232_v24 = vcombine.low %v215_v14, %v229_v17  ;;  %v1032_v21 = vpack.c.bf16 %v138_v26, %v137_v25  ;;  %v122_v29 = vld [vmem:[#allocation2 + $0x248] sm:$0xff]  ;;  %v1036_v33 = vpack.c.bf16 %v140_v31, %v139_v30  ;;  %v123_v34 = vld [vmem:[#allocation2 + $0x250] sm:$0xff]  ;;  %v124_v35 = vld [vmem:[#allocation2 + $0x258] sm:$0xff] }
  0x34   :  { %1017 = vmatprep.subr.bf16.mxu0 %v1016_v50  ;;  %v1034_v32 = vpack.c.bf16 %v122_v29, %v121_v28  ;;  %v141_v36 = vld [vmem:[#allocation2 + $0x2e0] sm:$0xff]  ;;  %v142_v37 = vld [vmem:[#allocation2 + $0x2e8] sm:$0xff]  ;;  %v1038_v38 = vpack.c.bf16 %v124_v35, %v123_v34  ;;  %v143_v42 = vld [vmem:[#allocation2 + $0x2f0] sm:$0xff] }
  0x35   :  { %1015 = vmatpush3.bf16.msra.mxu1 %v1014_v49  ;;  %v1040_v39 = vpack.c.bf16 %v142_v37, %v141_v36  ;;  %v125_v40 = vld [vmem:[#allocation2 + $0x260] sm:$0xff]  ;;  %v126_v41 = vld [vmem:[#allocation2 + $0x268] sm:$0xff]  ;;  %v144_v43 = vld [vmem:[#allocation2 + $0x2f8] sm:$0xff]  ;;  %v230_v49 = vcombine.low %v208_v13, %v222_v16 }
  0x36   :  { %1048 = vmatprep.subr.bf16.mxu1 %v1173_v63  ;;  %307 = vmatmul.mubr.f32.vlgmr.msra.gmra.mrb[0].mxu0 %v194_v55  ;;  %v1042_v44 = vpack.c.bf16 %v126_v41, %v125_v40  ;;  %v1044_v45 = vpack.c.bf16 %v144_v43, %v143_v42  ;;  %v127_v46 = vld [vmem:[#allocation2 + $0x270] sm:$0xff]  ;;  %v128_v47 = vld [vmem:[#allocation2 + $0x278] sm:$0xff]  ;;  %v523_v50 = vld [vmem:[%s1405_s3] sm:$0xff] }
  0x37   :  { %1019 = vmatpush3.bf16.msra.mxu0 %v1018_v56  ;;  %446 = vmatprep.mubr.f32.mxu0 %v231_v23  ;;  %v1046_v48 = vpack.c.bf16 %v128_v47, %v127_v46  ;;  %v524_v51 = vld [vmem:[%s1405_s3 + $0x8] sm:$0xff]  ;;  %v525_v52 = vld [vmem:[%s1405_s3 + $0x10] sm:$0xff]  ;;  %v526_v54 = vld [vmem:[%s1405_s3 + $0x18] sm:$0xff] }
  0x38   :  { %377 = vmatmul.mubr.f32.vlgmr.msra.gmra.mrb[0].mxu1 %v196_v57  ;;  %1021 = vmatprep.subr.bf16.mxu0 %v1020_v58  ;;  %v1052_v53 = vpack.c.bf16 %v524_v51, %v523_v50  ;;  %v1055_v55 = vpack.c.bf16 %v526_v54, %v525_v52  ;;  %v527_v56 = vld [vmem:[%s1405_s3 + $0x20] sm:$0xff]  ;;  %v528_v57 = vld [vmem:[%s1405_s3 + $0x28] sm:$0xff]  ;;  %v529_v59 = vld [vmem:[%s1405_s3 + $0x30] sm:$0xff] }
  0x39   :  { %879 = vmatprep.mubr.msk.f32.mxu1 %vm1174_vm0, %v1175_v10  ;;  %1050 = vmatpush3.bf16.msra.mxu1 %v1049_v15  ;;  %v1058_v58 = vpack.c.bf16 %v528_v57, %v527_v56  ;;  %v530_v60 = vld [vmem:[%s1405_s3 + $0x38] sm:$0xff]  ;;  %v531_v62 = vld [vmem:[%s1405_s3 + $0x40] sm:$0xff]  ;;  %v532_v0 = vld [vmem:[%s1405_s3 + $0x48] sm:$0xff] }
  0x3a   :  { %1051 = vmatprep.subr.bf16.mxu1 %v1173_v63  ;;  %v1061_v61 = vpack.c.bf16 %v530_v60, %v529_v59  ;;  %v1064_v1 = vpack.c.bf16 %v532_v0, %v531_v62  ;;  %v534_v3 = vld [vmem:[%s1405_s3 + $0x58] sm:$0xff]  ;;  %v535_v5 = vld [vmem:[%s1405_s3 + $0x60] sm:$0xff]  ;;  %v537_v8 = vld [vmem:[%s1405_s3 + $0x70] sm:$0xff] }
  0x3b   :  { %1023 = vmatpush3.bf16.msra.mxu0 %v1022_v2  ;;  %v533_v2 = vld [vmem:[%s1405_s3 + $0x50] sm:$0xff]  ;;  %v538_v9 = vld [vmem:[%s1405_s3 + $0x78] sm:$0xff]  ;;  %v617_v11 = vld [vmem:[%s1407_s5] sm:$0xff] }
  0x3c   :  { %1025 = vmatprep.subr.bf16.mxu0 %v1024_v6  ;;  %880 = vmatmul.mubr.msk.f32.vlgmr.msra.gmra.mrb[2].mxu1 %vm239_vm1, %v232_v24  ;;  %v1067_v4 = vpack.c.bf16 %v534_v3, %v533_v2  ;;  %v536_v6 = vld [vmem:[%s1405_s3 + $0x68] sm:$0xff]  ;;  %v619_v13 = vld [vmem:[%s1407_s5 + $0x10] sm:$0xff]  ;;  %v620_v15 = vld [vmem:[%s1407_s5 + $0x18] sm:$0xff] }
  0x3d   :  { %914 = vmatprep.mubr.msk.f32.mxu1 %vm1174_vm0, %v1175_v10  ;;  %1053 = vmatpush3.bf16.msra.mxu1 %v1052_v53  ;;  %v1070_v7 = vpack.c.bf16 %v536_v6, %v535_v5  ;;  %v618_v12 = vld [vmem:[%s1407_s5 + $0x8] sm:$0xff]  ;;  %v1079_v16 = vpack.c.bf16 %v620_v15, %v619_v13  ;;  %v621_v17 = vld [vmem:[%s1407_s5 + $0x20] sm:$0xff]  ;;  %v623_v20 = vld [vmem:[%s1407_s5 + $0x30] sm:$0xff] }
  0x3e   :  { %1054 = vmatprep.subr.bf16.mxu1 %v1173_v63  ;;  %v1076_v14 = vpack.c.bf16 %v618_v12, %v617_v11  ;;  %v624_v22 = vld [vmem:[%s1407_s5 + $0x38] sm:$0xff]  ;;  %v625_v24 = vld [vmem:[%s1407_s5 + $0x40] sm:$0xff]  ;;  %v626_v25 = vld [vmem:[%s1407_s5 + $0x48] sm:$0xff] }
  0x3f   :  { %1027 = vmatpush3.bf16.msra.mxu0 %v1026_v18  ;;  %v622_v18 = vld [vmem:[%s1407_s5 + $0x28] sm:$0xff]  ;;  %v1085_v23 = vpack.c.bf16 %v624_v22, %v623_v20  ;;  %v1088_v26 = vpack.c.bf16 %v626_v25, %v625_v24  ;;  %v629_v29 = vld [vmem:[%s1407_s5 + $0x60] sm:$0xff] }
  0x40   :  { %1029 = vmatprep.subr.bf16.mxu0 %v1028_v19  ;;  %v1082_v19 = vpack.c.bf16 %v622_v18, %v621_v17  ;;  %v630_v30 = vld [vmem:[%s1407_s5 + $0x68] sm:$0xff]  ;;  %v731_v51 = vld [vmem:[%s1406_s4] ss:$0 sm:$0xff] }
  0x41   :  { %1056 = vmatpush3.bf16.msra.mxu1 %v1055_v55  ;;  %v1094_v31 = vpack.c.bf16 %v630_v30, %v629_v29  ;;  %v732_v56 = vld [vmem:[%s1408_s6] ss:$0 sm:$0xff] }
  0x42   :  { %1057 = vmatprep.subr.bf16.mxu1 %v1173_v63 }
  0x43   :  { %1031 = vmatpush3.bf16.msra.mxu0 %v1030_v27  ;;  %v627_v27 = vld [vmem:[%s1407_s5 + $0x50] sm:$0xff] }
  0x44   :  { %1033 = vmatprep.subr.bf16.mxu0 %v1032_v21  ;;  %v628_v21 = vld [vmem:[%s1407_s5 + $0x58] sm:$0xff] }
  0x45   :  { %1059 = vmatpush3.bf16.msra.mxu1 %v1058_v58  ;;  %v1091_v28 = vpack.c.bf16 %v628_v21, %v627_v27 }
  0x46   :  { %1060 = vmatprep.subr.bf16.mxu1 %v1173_v63 }
  0x47   :  { %1035 = vmatpush3.bf16.msra.mxu0 %v1034_v32 }
  0x48   :  { %1037 = vmatprep.subr.bf16.mxu0 %v1036_v33  ;;  %v729_v33 = vld [vmem:[%s1404_s2] ss:$0 sm:$0xff] }
  0x49   :  { %1062 = vmatpush3.bf16.msra.mxu1 %v1061_v61 }
  0x4a   :  { %1063 = vmatprep.subr.bf16.mxu1 %v1173_v63 }
  0x4b   :  { %1039 = vmatpush3.bf16.msra.mxu0 %v1038_v38 }
  0x4c   :  { %1041 = vmatprep.subr.bf16.mxu0 %v1040_v39 }
  0x4d   :  { %1065 = vmatpush3.bf16.msra.mxu1 %v1064_v1 }
  0x4e   :  { %1066 = vmatprep.subr.bf16.mxu1 %v1173_v63 }
  0x4f   :  { %1043 = vmatpush3.bf16.msra.mxu0 %v1042_v44 }
  0x50   :  { %1045 = vmatprep.subr.bf16.mxu0 %v1044_v45 }
  0x51   :  { %1068 = vmatpush3.bf16.msra.mxu1 %v1067_v4 }
  0x52   :  { %1069 = vmatprep.subr.bf16.mxu1 %v1173_v63 }
  0x53   :  { %1047 = vmatpush3.bf16.msra.mxu0 %v1046_v48  ;;  %v631_v48 = vld [vmem:[%s1407_s5 + $0x70] sm:$0xff] }
  0x54   :  { %1075 = vmatprep.subr.bf16.mxu0 %v1173_v63 }
  0x55   :  { %1071 = vmatpush3.bf16.msra.mxu1 %v1070_v7 }
  0x56   :  { %447 = vmatmul.mubr.f32.vlgmr.msra.gmra.mrb[2].mxu0 %v230_v49  ;;  %1072 = vmatprep.subr.bf16.mxu1 %v1173_v63  ;;  %v632_v49 = vld [vmem:[%s1407_s5 + $0x78] sm:$0xff] }
  0x57   :  { %949 = vmatprep.mubr.msk.f32.mxu0 %vm1174_vm0, %v1175_v10  ;;  %v1073_v10 = vpack.c.bf16 %v538_v9, %v537_v8  ;;  %1077 = vmatpush3.bf16.msra.mxu0 %v1076_v14  ;;  %v1097_v50 = vpack.c.bf16 %v632_v49, %v631_v48 }
  0x58   :  { %1078 = vmatprep.subr.bf16.mxu0 %v1173_v63 }
  0x59   :  { %1074 = vmatpush3.bf16.msra.mxu1 %v1073_v10 }
  0x5b   :  { %1080 = vmatpush3.bf16.msra.mxu0 %v1079_v16 }
  0x5c   :  { %1081 = vmatprep.subr.bf16.mxu0 %v1173_v63 }
  0x5f   :  { %1083 = vmatpush3.bf16.msra.mxu0 %v1082_v19 }
  0x60   :  { %1084 = vmatprep.subr.bf16.mxu0 %v1173_v63 }
  0x63   :  { %1086 = vmatpush3.bf16.msra.mxu0 %v1085_v23 }
  0x64   :  { %1087 = vmatprep.subr.bf16.mxu0 %v1173_v63 }
  0x67   :  { %1089 = vmatpush3.bf16.msra.mxu0 %v1088_v26 }
  0x68   :  { %1090 = vmatprep.subr.bf16.mxu0 %v1173_v63 }
  0x6b   :  { %1092 = vmatpush3.bf16.msra.mxu0 %v1091_v28 }
  0x6c   :  { %1093 = vmatprep.subr.bf16.mxu0 %v1173_v63 }
  0x6f   :  { %1095 = vmatpush3.bf16.msra.mxu0 %v1094_v31 }
  0x70   :  { %1096 = vmatprep.subr.bf16.mxu0 %v1173_v63 }
  0x73   :  { %1098 = vmatpush3.bf16.msra.mxu0 %v1097_v50 }
 0x109   :  { %v765_v32 = vpop.f32.mrb[0].mxu0 }
 0x10a   :  { %v766_v34 = vpop.f32.mrb[1].mxu0 }
 0x10b   :  { %v800_v35 = vpop.f32.mrb[0].mxu1  ;;  %v767_v36 = vadd.f32 %v766_v34, %v765_v32 }
 0x10c   :  { %v801_v37 = vpop.f32.mrb[1].mxu1 }
 0x10d   :  { %v802_v38 = vadd.f32 %v801_v37, %v800_v35  ;;  %v309_v39 = vadd.f32 %v767_v36, %v729_v33 }
 0x10f   :  { %v379_v40 = vadd.f32 %v802_v38, %v309_v39  ;;  %v518_v41 = vpop.f32.mrb[2].mxu1 }
 0x110   :  { %v881_v42 = vpop.f32.mrb[3].mxu1 }
 0x129   :  { %v835_v43 = vpop.f32.mrb[2].mxu0 }
 0x12a   :  { %v836_v44 = vpop.f32.mrb[3].mxu0 }
 0x12b   :  { %v837_v45 = vadd.f32 %v836_v44, %v835_v43 }
 0x12d   :  { %v449_v46 = vadd.f32 %v837_v45, %v379_v40 }
 0x12f   :  { %v519_v47 = vadd.f32 %v518_v41, %v449_v46 }
 0x131   :  { %v522_v63 = vmax.f32 %v519_v47, 0.0 }
 0x133   :  { %915 = vmatmul.mubr.f32.vlgmr.msra.gmra.mrb[4].mxu1 %v522_v63 }
 0x206   :  { %v612_v52 = vpop.f32.mrb[4].mxu1 }
 0x207   :  { %v613_v53 = vadd.f32 %v731_v51, %v612_v52  ;;  %v916_v54 = vpop.f32.mrb[5].mxu1 }
 0x209   :  { %v616_v55 = vmax.f32 %v613_v53, 0.0 }
 0x20b   :  { %950 = vmatmul.mubr.f32.vlgmr.msra.gmra.mrb[4].mxu0 %v616_v55 }
 0x2de   :  { %v706_v57 = vpop.f32.mrb[4].mxu0 }
 0x2df   :  { %v707_v58 = vadd.f32 %v732_v56, %v706_v57  ;;  %v951_v59 = vpop.f32.mrb[5].mxu0 }
 0x2e1   :  { %711 = vst.msk [vmem:[#allocation5] sm:$0xff] %vm710_vm2, %v707_v58 }
 0x2e2   :  { %716 = vsyncadd [#allocation4], 96  ;;  %s1176_s5 = smov [#allocation5]  }
 0x2e3   :  { %s717_s22 = sshll.u32 %s1176_s5, 4  ;;  %s718_s22 = int_to_ptr.vmem [resolvable:$true] %s717_s22 }
 0x2e4   :  { %s1143_s23 = scalar_lea.vmem %s718_s22, 32  ;;  %s1147_s4 = scalar_lea.vmem %s718_s22, 128 }
 0x2e5   :  { %p1144_p8 = scmp.ne.s32.totalorder %s718_s22, %s1143_s23  ;;  %p1148_p9 = scmp.lt.s32.totalorder %s718_s22, %s718_s22 }
 0x2e6   :  { %p1149_p10 = scmp.lt.s32.totalorder %s1147_s4, %s1143_s23 }
 0x2e8   :  { %p1150_p11 = por %p1149_p10, %p1148_p9 }
 0x2ea   :  { %p1151_p12 = pnand %p1150_p11, %p1144_p8 }
 0x2ec   :  { %1154 = shalt.err (!%p1151_p12)
}
 0x2ed   :  { %s1155_s6 = scalar_lea.hbm %s1409_s7, 32 }
 0x2ee   :  { %p1156_p13 = scmp.ne.s32.totalorder %s1409_s7, %s1155_s6  ;;  %p1159_p0 = scmp.lt.u32.totalorder %s1155_s6, %s1409_s7 }
 0x2f0   :  { %p1161_p1 = pnand %p1159_p0, %p1156_p13 }
 0x2f2   :  { %1164 = shalt.err (!%p1161_p1)
}
 0x2f3   :  { %s1177_s0 = smov 32   ;;  %s1178_s30 = smov 2  }
 0x2f4   :  { %723 = dma.vmem_to_hbm [thread:$0]  %s718_s22, 32, %s1409_s7, [#allocation4], %s1177_s0, %s1177_s0, %s1178_s30  }
 0x2f5   :  { %1167 = dma.done.wait [#allocation4], 128  }
 0x2f6   :  { %1168 = vsyncadd [#allocation4], 4294967168 }
 0x2f7   :  { %727 = vsyncpa [#allocation3], 1 }
 0x2f8   :  { %728 = vsyncpa [#allocation4], 1 }

</bundles_post_ra>
